<compile_context>
chip_gen: v7x
topology: tpu7x:2x2x1
jax: 0.10.0
libtpu: 0.0.40
codegen_flags: <defaults>
</compile_context>

<pallas_src>
import jax
import jax.numpy as jnp
from jax.experimental import pallas as pl
from jax.experimental.pallas import tpu as pltpu

BN_EPS = 1e-5


def _predictor_kernel(x_ref, w1_ref, b1_ref, g_ref, beta_ref, w2_ref, b2_ref,
                      o_ref, acc_ref):
    j = pl.program_id(0)

    # Fold the layer-2 bias into the accumulator init (saves a full
    # [N, in_dim] VALU add at writeback).
    @pl.when(j == 0)
    def _():
        acc_ref[...] = jnp.broadcast_to(
            b2_ref[...].astype(jnp.float32), acc_ref.shape)

    # ---- layer 1 for this hidden tile: Linear (bf16 MXU, f32 accumulate) ----
    h = jnp.dot(x_ref[...], w1_ref[...],
                preferred_element_type=jnp.float32) + b1_ref[...]

    # ---- BatchNorm1d: training-mode batch stats (biased var), f32 ----
    inv_n = 1.0 / h.shape[0]
    mean = jnp.sum(h, axis=0, keepdims=True) * inv_n
    centered = h - mean
    var = jnp.sum(centered * centered, axis=0, keepdims=True) * inv_n
    scale = jax.lax.rsqrt(var + BN_EPS) * g_ref[...]   # gamma folded into inv_std
    h = centered * scale + beta_ref[...]

    # ---- ReLU ----
    h = jnp.maximum(h, 0.0)

    # ---- layer 2 partial product for this hidden tile, accumulated in f32 ----
    acc_ref[...] += jnp.dot(h.astype(jnp.bfloat16), w2_ref[...],
                            preferred_element_type=jnp.float32)

    @pl.when(j == pl.num_programs(0) - 1)
    def _():
        o_ref[...] = acc_ref[...].astype(o_ref.dtype)


def _pick_hidden_tile(hidden):
    for th in (512, 256, 128):
        if hidden % th == 0:
            return th
    return hidden  # small / odd hidden: single tile


def prediction_mlp(x, params, *, hidden_tile=None):
    """x: [N, in_dim] float32. params: dict of weights (see init_params)."""
    n, in_dim = x.shape
    hidden = params["w1"].shape[1]
    th = hidden_tile or _pick_hidden_tile(hidden)
    assert hidden % th == 0
    n_tiles = hidden // th

    # bf16 MXU inputs; biases / BN params stay f32.
    xb = x.astype(jnp.bfloat16)
    w1 = params["w1"].astype(jnp.bfloat16)
    w2 = params["w2"].astype(jnp.bfloat16)

    # Explicit VMEM budget: resident x / acc / out + double-buffered weight tiles.
    vmem_bytes = (
        n * in_dim * 2            # x (bf16, resident across grid steps)
        + n * in_dim * 4          # f32 accumulator scratch
        + 2 * n * in_dim * 4      # output block
        + 2 * in_dim * th * 2     # w1 tile, double-buffered (bf16)
        + 2 * th * in_dim * 2     # w2 tile, double-buffered (bf16)
        + 16 * (th + in_dim) * 4  # bias / BN vectors + padding slack
    )
    vmem_limit = max(32 << 20, min(int(vmem_bytes * 1.5) + (4 << 20), 100 << 20))

    return pl.pallas_call(
        _predictor_kernel,
        out_shape=jax.ShapeDtypeStruct((n, in_dim), x.dtype),
        grid_spec=pltpu.PrefetchScalarGridSpec(
            num_scalar_prefetch=0,
            grid=(n_tiles,),
            in_specs=[
                pl.BlockSpec((n, in_dim), lambda j: (0, 0)),   # x (resident)
                pl.BlockSpec((in_dim, th), lambda j: (0, j)),  # w1 tile
                pl.BlockSpec((1, th), lambda j: (0, j)),       # b1 tile
                pl.BlockSpec((1, th), lambda j: (0, j)),       # gamma tile
                pl.BlockSpec((1, th), lambda j: (0, j)),       # beta tile
                pl.BlockSpec((th, in_dim), lambda j: (j, 0)),  # w2 tile
                pl.BlockSpec((1, in_dim), lambda j: (0, 0)),   # b2 (resident)
            ],
            out_specs=pl.BlockSpec((n, in_dim), lambda j: (0, 0)),
            scratch_shapes=[pltpu.VMEM((n, in_dim), jnp.float32)],
        ),
        compiler_params=pltpu.CompilerParams(
            dimension_semantics=("arbitrary",),  # reduction into the accumulator
            vmem_limit_bytes=vmem_limit,
        ),
    )(xb, w1, params["b1"], params["gamma"], params["beta"], w2, params["b2"])


def init_params(key, in_dim, hidden_dim):
    """Deterministic synthetic init mimicking nn.Linear shapes (pre-transposed)."""
    k1, k2, k3, k4 = jax.random.split(key, 4)
    lim1 = 1.0 / jnp.sqrt(jnp.float32(in_dim))
    lim2 = 1.0 / jnp.sqrt(jnp.float32(hidden_dim))
    return {
        "w1": jax.random.uniform(k1, (in_dim, hidden_dim), jnp.float32, -lim1, lim1),
        "b1": jax.random.uniform(k2, (1, hidden_dim), jnp.float32, -lim1, lim1),
        "gamma": jnp.ones((1, hidden_dim), jnp.float32),
        "beta": jnp.zeros((1, hidden_dim), jnp.float32),
        "w2": jax.random.uniform(k3, (hidden_dim, in_dim), jnp.float32, -lim2, lim2),
        "b2": jax.random.uniform(k4, (1, in_dim), jnp.float32, -lim2, lim2),
    }


def reference(x, p):
    """Pure-JAX reference using the same numeric scheme (bf16 matmuls, f32 BN)."""
    xb = x.astype(jnp.bfloat16)
    w1 = p["w1"].astype(jnp.bfloat16)
    w2 = p["w2"].astype(jnp.bfloat16)
    h = jnp.dot(xb, w1, preferred_element_type=jnp.float32) + p["b1"]
    mean = h.mean(axis=0, keepdims=True)
    var = ((h - mean) ** 2).mean(axis=0, keepdims=True)  # biased, like BN training
    h = (h - mean) / jnp.sqrt(var + BN_EPS) * p["gamma"] + p["beta"]
    h = jnp.maximum(h, 0.0)
    return jnp.dot(h.astype(jnp.bfloat16), w2,
                   preferred_element_type=jnp.float32) + p["b2"]


if __name__ == "__main__":
    key = jax.random.PRNGKey(0)
    kx, kp = jax.random.split(key)

    # Small but lane-aligned shapes; hidden_tile=128 exercises the 2-step
    # accumulator path (grid=(2,)).
    batch, in_dim, hidden_dim = 32, 128, 256
    x = jax.random.normal(kx, (batch, in_dim), jnp.float32)
    params = init_params(kp, in_dim, hidden_dim)

    out = prediction_mlp(x, params, hidden_tile=128)
    jax.block_until_ready(out)

    ref = reference(x, params)
    assert out.shape == (batch, in_dim)
    assert jnp.allclose(out, ref, atol=1e-2, rtol=1e-2), float(
        jnp.max(jnp.abs(out - ref)))

    print("KERNEL_OK")
</pallas_src>

<mosaic_0001>
module attributes {stable_mosaic.version = 11 : i64} {
  func.func @_predictor_kernel(%arg0: i32, %arg1: memref<32x128xbf16, #tpu.memory_space<vmem>>, %arg2: memref<128x128xbf16, #tpu.memory_space<vmem>>, %arg3: memref<1x128xf32, #tpu.memory_space<vmem>>, %arg4: memref<1x128xf32, #tpu.memory_space<vmem>>, %arg5: memref<1x128xf32, #tpu.memory_space<vmem>>, %arg6: memref<128x128xbf16, #tpu.memory_space<vmem>>, %arg7: memref<1x128xf32, #tpu.memory_space<vmem>>, %arg8: memref<32x128xf32, #tpu.memory_space<vmem>>, %arg9: memref<32x128xf32, #tpu.memory_space<vmem>>) attributes {dimension_semantics = [#tpu.dimension_semantics<arbitrary>], iteration_bounds = array<i64: 2>, scalar_prefetch = 0 : i64, scratch_operands = 1 : i64, tpu.core_type = #tpu.core_type<tc>, window_params = [{pipeline_mode = #tpu.pipeline_mode<synchronous>, transform_indices = @transform_0, window_bounds = array<i64: 32, 128>}, {transform_indices = @transform_1, window_bounds = array<i64: 128, 128>}, {transform_indices = @transform_2, window_bounds = array<i64: 1, 128>}, {transform_indices = @transform_3, window_bounds = array<i64: 1, 128>}, {transform_indices = @transform_4, window_bounds = array<i64: 1, 128>}, {transform_indices = @transform_5, window_bounds = array<i64: 128, 128>}, {pipeline_mode = #tpu.pipeline_mode<synchronous>, transform_indices = @transform_6, window_bounds = array<i64: 1, 128>}, {pipeline_mode = #tpu.pipeline_mode<synchronous>, transform_indices = @transform_7, window_bounds = array<i64: 32, 128>}]} {
    %c0_i32 = arith.constant 0 : i32
    %0 = arith.cmpi eq, %arg0, %c0_i32 : i32
    %1 = arith.extui %0 : i1 to i32
    %c0_i32_0 = arith.constant 0 : i32
    %2 = arith.cmpi ne, %1, %c0_i32_0 : i32
    scf.if %2 {
      %c0_24 = arith.constant 0 : index
      %c0_25 = arith.constant 0 : index
      %41 = vector.load %arg7[%c0_24, %c0_25] : memref<1x128xf32, #tpu.memory_space<vmem>>, vector<1x128xf32>
      %42 = vector.shape_cast %41 : vector<1x128xf32> to vector<1x128xf32>
      %43 = vector.broadcast %42 : vector<1x128xf32> to vector<32x128xf32>
      %c0_26 = arith.constant 0 : index
      %c0_27 = arith.constant 0 : index
      %44 = vector.load %arg9[%c0_26, %c0_27] : memref<32x128xf32, #tpu.memory_space<vmem>>, vector<32x128xf32>
      tpu.vector_store %arg9[%c0_26, %c0_27], %43 {strides = array<i32>} : memref<32x128xf32, #tpu.memory_space<vmem>>, vector<32x128xf32>,
    } else {
    }
    %c0 = arith.constant 0 : index
    %c0_1 = arith.constant 0 : index
    %3 = vector.load %arg1[%c0, %c0_1] : memref<32x128xbf16, #tpu.memory_space<vmem>>, vector<32x128xbf16>
    %c0_2 = arith.constant 0 : index
    %c0_3 = arith.constant 0 : index
    %4 = vector.load %arg2[%c0_2, %c0_3] : memref<128x128xbf16, #tpu.memory_space<vmem>>, vector<128x128xbf16>
    %cst = arith.constant dense<0.000000e+00> : vector<32x128xf32>
    %5 = tpu.matmul %3, %4, %cst {dimension_numbers = #tpu.dot_dimension_numbers<[1], [0], [0], [1], [0, 0, 1, 1], [], []>} : vector<32x128xbf16>, vector<128x128xbf16>, vector<32x128xf32> -> vector<32x128xf32>
    %c0_4 = arith.constant 0 : index
    %c0_5 = arith.constant 0 : index
    %6 = vector.load %arg3[%c0_4, %c0_5] : memref<1x128xf32, #tpu.memory_space<vmem>>, vector<1x128xf32>
    %7 = vector.broadcast %6 : vector<1x128xf32> to vector<32x128xf32>
    %8 = arith.addf %5, %7 : vector<32x128xf32>
    %cst_6 = arith.constant dense<0.000000e+00> : vector<128xf32>
    %9 = vector.multi_reduction <add>, %8, %cst_6 [0] : vector<32x128xf32> to vector<128xf32>
    %10 = vector.shape_cast %9 : vector<128xf32> to vector<1x128xf32>
    %cst_7 = arith.constant 3.125000e-02 : f32
    %11 = vector.broadcast %cst_7 : f32 to vector<1x128xf32>
    %12 = arith.mulf %10, %11 : vector<1x128xf32>
    %13 = vector.broadcast %12 : vector<1x128xf32> to vector<32x128xf32>
    %14 = arith.subf %8, %13 : vector<32x128xf32>
    %15 = arith.mulf %14, %14 : vector<32x128xf32>
    %cst_8 = arith.constant dense<0.000000e+00> : vector<128xf32>
    %16 = vector.multi_reduction <add>, %15, %cst_8 [0] : vector<32x128xf32> to vector<128xf32>
    %17 = vector.shape_cast %16 : vector<128xf32> to vector<1x128xf32>
    %cst_9 = arith.constant 3.125000e-02 : f32
    %18 = vector.broadcast %cst_9 : f32 to vector<1x128xf32>
    %19 = arith.mulf %17, %18 : vector<1x128xf32>
    %cst_10 = arith.constant 9.99999974E-6 : f32
    %20 = vector.broadcast %cst_10 : f32 to vector<1x128xf32>
    %21 = arith.addf %19, %20 : vector<1x128xf32>
    %22 = math.rsqrt %21 : vector<1x128xf32>
    %c0_11 = arith.constant 0 : index
    %c0_12 = arith.constant 0 : index
    %23 = vector.load %arg4[%c0_11, %c0_12] : memref<1x128xf32, #tpu.memory_space<vmem>>, vector<1x128xf32>
    %24 = arith.mulf %22, %23 : vector<1x128xf32>
    %25 = vector.broadcast %24 : vector<1x128xf32> to vector<32x128xf32>
    %26 = arith.mulf %14, %25 : vector<32x128xf32>
    %c0_13 = arith.constant 0 : index
    %c0_14 = arith.constant 0 : index
    %27 = vector.load %arg5[%c0_13, %c0_14] : memref<1x128xf32, #tpu.memory_space<vmem>>, vector<1x128xf32>
    %28 = vector.broadcast %27 : vector<1x128xf32> to vector<32x128xf32>
    %29 = arith.addf %26, %28 : vector<32x128xf32>
    %cst_15 = arith.constant 0.000000e+00 : f32
    %30 = vector.broadcast %cst_15 : f32 to vector<32x128xf32>
    %31 = arith.maximumf %29, %30 : vector<32x128xf32>
    %c0_16 = arith.constant 0 : index
    %c0_17 = arith.constant 0 : index
    %32 = vector.load %arg9[%c0_16, %c0_17] : memref<32x128xf32, #tpu.memory_space<vmem>>, vector<32x128xf32>
    %33 = arith.truncf %31 : vector<32x128xf32> to vector<32x128xbf16>
    %c0_18 = arith.constant 0 : index
    %c0_19 = arith.constant 0 : index
    %34 = vector.load %arg6[%c0_18, %c0_19] : memref<128x128xbf16, #tpu.memory_space<vmem>>, vector<128x128xbf16>
    %cst_20 = arith.constant dense<0.000000e+00> : vector<32x128xf32>
    %35 = tpu.matmul %33, %34, %cst_20 {dimension_numbers = #tpu.dot_dimension_numbers<[1], [0], [0], [1], [0, 0, 1, 1], [], []>} : vector<32x128xbf16>, vector<128x128xbf16>, vector<32x128xf32> -> vector<32x128xf32>
    %36 = arith.addf %32, %35 : vector<32x128xf32>
    %c0_21 = arith.constant 0 : index
    %c0_22 = arith.constant 0 : index
    %37 = vector.load %arg9[%c0_21, %c0_22] : memref<32x128xf32, #tpu.memory_space<vmem>>, vector<32x128xf32>
    tpu.vector_store %arg9[%c0_21, %c0_22], %36 {strides = array<i32>} : memref<32x128xf32, #tpu.memory_space<vmem>>, vector<32x128xf32>,
    %c1_i32 = arith.constant 1 : i32
    %38 = arith.cmpi eq, %arg0, %c1_i32 : i32
    %39 = arith.extui %38 : i1 to i32
    %c0_i32_23 = arith.constant 0 : i32
    %40 = arith.cmpi ne, %39, %c0_i32_23 : i32
    scf.if %40 {
      %c0_24 = arith.constant 0 : index
      %c0_25 = arith.constant 0 : index
      %41 = vector.load %arg9[%c0_24, %c0_25] : memref<32x128xf32, #tpu.memory_space<vmem>>, vector<32x128xf32>
      %c0_26 = arith.constant 0 : index
      %c0_27 = arith.constant 0 : index
      %42 = vector.load %arg8[%c0_26, %c0_27] : memref<32x128xf32, #tpu.memory_space<vmem>>, vector<32x128xf32>
      tpu.vector_store %arg8[%c0_26, %c0_27], %41 {strides = array<i32>} : memref<32x128xf32, #tpu.memory_space<vmem>>, vector<32x128xf32>,
    } else {
    }
    return
  }
  func.func @transform_0(%arg0: i32) -> (i32, i32) {
    %c0_i32 = arith.constant 0 : i32
    %c0_i32_0 = arith.constant 0 : i32
    %c0_i32_1 = arith.constant 0 : i32
    return %c0_i32, %c0_i32_0 : i32, i32
  }
  func.func @transform_1(%arg0: i32) -> (i32, i32) {
    %c0_i32 = arith.constant 0 : i32
    %c0_i32_0 = arith.constant 0 : i32
    return %c0_i32, %arg0 : i32, i32
  }
  func.func @transform_2(%arg0: i32) -> (i32, i32) {
    %c0_i32 = arith.constant 0 : i32
    %c0_i32_0 = arith.constant 0 : i32
    return %c0_i32, %arg0 : i32, i32
  }
  func.func @transform_3(%arg0: i32) -> (i32, i32) {
    %c0_i32 = arith.constant 0 : i32
    %c0_i32_0 = arith.constant 0 : i32
    return %c0_i32, %arg0 : i32, i32
  }
  func.func @transform_4(%arg0: i32) -> (i32, i32) {
    %c0_i32 = arith.constant 0 : i32
    %c0_i32_0 = arith.constant 0 : i32
    return %c0_i32, %arg0 : i32, i32
  }
  func.func @transform_5(%arg0: i32) -> (i32, i32) {
    %c0_i32 = arith.constant 0 : i32
    %c0_i32_0 = arith.constant 0 : i32
    return %arg0, %c0_i32 : i32, i32
  }
  func.func @transform_6(%arg0: i32) -> (i32, i32) {
    %c0_i32 = arith.constant 0 : i32
    %c0_i32_0 = arith.constant 0 : i32
    %c0_i32_1 = arith.constant 0 : i32
    return %c0_i32, %c0_i32_0 : i32, i32
  }
  func.func @transform_7(%arg0: i32) -> (i32, i32) {
    %c0_i32 = arith.constant 0 : i32
    %c0_i32_0 = arith.constant 0 : i32
    %c0_i32_1 = arith.constant 0 : i32
    return %c0_i32, %c0_i32_0 : i32, i32
  }
}

</mosaic_0001>

<bundles_post_ra>
// kernel: tpu_custom_call.1
= control target key start
LH: loop header
LB: loop body
LE: loop exit
PB: predicated region body
PF: predicated region fallthrough
CT: control target
= control target key end

     0   :  { %12 = vsyncpa [#allocation4], 0  ;;  %s1505_s0 = inlined_call_operand.hbm [shape: bf16[32,128], index: 0, kind: input, shape index: {}]   ;;  %s1506_s1 = inlined_call_operand.hbm [shape: bf16[128,256], index: 1, kind: input, shape index: {}]   ;;  %s1507_s2 = inlined_call_operand.vmem [shape: f32[1,256], index: 2, kind: input, shape index: {}]   ;;  %s1508_s3 = inlined_call_operand.vmem [shape: f32[1,256], index: 3, kind: input, shape index: {}]   ;;  %s1509_s4 = inlined_call_operand.vmem [shape: f32[1,256], index: 4, kind: input, shape index: {}]   ;;  %s1510_s5 = inlined_call_operand.hbm [shape: bf16[256,128], index: 5, kind: input, shape index: {}]   ;;  %s1511_s6 = inlined_call_operand.vmem [shape: f32[1,128], index: 6, kind: input, shape index: {}]   ;;  %s1512_s7 = inlined_call_operand.hbm [shape: f32[32,128], index: 7, kind: output, shape index: {}]  }
   0x1   :  { %13 = vsyncpa [#allocation7], 0 }
   0x2   :  { %15 = vsyncpa [#allocation7 + $0x1], 0 }
   0x3   :  { %16 = vsyncpa [#allocation5], 0  ;;  %s1238_s24 = smov 0   ;;  %s1240_s25 = smov 0  }
   0x4   :  { %s1242_s26 = smov 0   ;;  %s1244_s27 = smov 0  }
   0x5 LB: > { %s1259_s28 = sadd.s32 1, %s1187_s27   ;;  %s50_s29 = sadd.s32 1, %s1183_s26  ;;  %s1187_s27 = sphi %s1244_s27, %s1540_s27   ;;  %s1183_s26 = sphi %s1242_s26, %s1539_s26   ;;  %s1179_s25 = sphi %s1240_s25, %s1538_s25   ;;  %s1175_s24 = sphi %s1238_s24, %s1537_s24  }
   0x6   : > { %s47_s30 = ssub.s32 %s1187_s27, %s1259_s28  ;;  %p57_p0 = scmp.ne.s32.totalorder %s1183_s26, %s1179_s25 }
   0x7   : > { %p48_p1 = scmp.eq.s32.totalorder %s47_s30, 0  ;;  %p58_p2 = scmp.eq.s32.totalorder %s1187_s27, 0 }
   0x8   : > { %p968_p4 = scmp.lt.s32.totalorder %s1187_s27, 2  ;;  %s249_s9 = sand.u32 1, %s1187_s27  }
   0x9   : > { %s1268_s8 = scalar_select %p48_p1, %s1183_s26, %s50_s29  }
   0xa   : > { %p59_p3 = por %p58_p2, %p57_p0  ;;  %s251_s10 = sand.u32 1, %s1183_s26  }
   0xb   : > { %s1273_s11 = sshll.u32 %s251_s10, 6  ;;  %s848_s12 = sshll.u32 %s1187_s27, 6 }
   0xc   : > { %s1279_s15 = scalar_lea.hbm %s1506_s1, %s848_s12  ;;  %s253_s16 = scalar_lea.vmem [#allocation6], %s1273_s11 }
   0xd   : > { %s259_s17 = sshll.u32 %s253_s16, 4  ;;  %p1282_p5 = pnand %p968_p4, %p59_p3  ;;  %s1286_s17 = int_to_ptr.vmem [resolvable:$true] %s259_s17 }
   0xe   : > { %s1288_s19 = scalar_lea.sflag [#allocation7], %s249_s9  ;;  %s1031_s20 = scalar_lea.hbm %s1279_s15, 1024 }
   0xf   : > { %s1523_s18 = scalar_select %p1282_p5, 1, 0 }
  0x10   : > { %p1032_p6 = scmp.ne.s32.totalorder %s1279_s15, %s1031_s20  ;;  %p1518_p7 = pneg %p1282_p5 }
  0x11   : > { %s1036_s23 = scalar_lea.hbm %s1506_s1, 2048  ;;  %p1037_p10 = scmp.lt.u32.totalorder %s1279_s15, %s1506_s1 }
  0x12   : > { %p1034_p8 = pnand %p1518_p7, %p1032_p6  ;;  %p1038_p11 = scmp.lt.u32.totalorder %s1036_s23, %s1031_s20 }
  0x13   : > { %p1040_p13 = scmp.lt.u32.totalorder %s1031_s20, %s1279_s15 }
  0x14   : > { %p1035_p9 = pneg %p1034_p8  ;;  %p1039_p12 = por %p1038_p11, %p1037_p10 }
  0x16   : > { %p1041_p0 = por %p1040_p13, %p1039_p12 }
  0x18   : > { %p1042_p1 = pnand %p1041_p0, %p1035_p9 }
  0x1a   : > { %1045 = shalt.err (!%p1042_p1)
}
  0x1b   : > { %s1046_s9 = scalar_lea.vmem %s1286_s17, 1024  ;;  %s1189_s10 = smov [#allocation6]  }
  0x1c   : > { %p1047_p2 = scmp.ne.s32.totalorder %s1286_s17, %s1046_s9  ;;  %s1051_s12 = sshll.u32 %s1189_s10, 4  ;;  %s1052_s12 = int_to_ptr.vmem [resolvable:$false] %s1051_s12 }
  0x1d   : > { %s1053_s13 = scalar_lea.vmem %s1052_s12, 2048  ;;  %p1054_p6 = scmp.lt.s32.totalorder %s1286_s17, %s1052_s12 }
  0x1e   : > { %p1049_p3 = pnand %p1047_p2, %p1518_p7  ;;  %p1055_p8 = scmp.lt.s32.totalorder %s1053_s13, %s1046_s9 }
  0x20   : > { %p1050_p4 = pneg %p1049_p3  ;;  %p1056_p10 = por %p1055_p8, %p1054_p6 }
  0x22   : > { %p1057_p11 = pnand %p1056_p10, %p1050_p4 }
  0x24   : > { %1060 = shalt.err (!%p1057_p11)
}
  0x25   : > { %s1190_s14 = smov 128   ;;  %s1513_s16 = smov 64  }
  0x26   : > { %s1515_s20 = smov 4   ;;  %s1319_s21 = sadd.s32 4294967295, %s1187_s27  }
  0x27   : > { %963 = dma.hbm_to_vmem [thread:$0]  (!%p1282_p5), %s1279_s15, 1024, %s1286_s17, %s1288_s19, %s1190_s14, %s1513_s16, %s1515_s20  }
  0x28   : > { %p63_p9 = scmp.ne.s32.totalorder %s1179_s25, %s1175_s24  ;;  %p1517_p12 = scmp.eq.s32.totalorder %s1319_s21, 0 }
  0x29   : > { %p844_p13 = scmp.ge.s32.totalorder %s1187_s27, 1  ;;  %p220_p0 = scmp.lt.s32.totalorder %s1187_s27, 3 }
  0x2a   : > { %p1328_p1 = por %p1517_p12, %p63_p9  ;;  %s1193_s15 = smov [#allocation3]  }
  0x2b   : > { %p1333_p3 = pnand %p844_p13, %p220_p0  ;;  %s232_s17 = sshll.u32 %s1193_s15, 4  ;;  %s233_s17 = int_to_ptr.vmem [resolvable:$true] %s232_s17 }
  0x2c   : > { %s1524_s22 = scalar_select %p1328_p1, 1, 0 }
  0x2d   : > { %s1525_s23 = scalar_select %p1333_p3, 1, 0 }
  0x2e   : > { %p956_p4 = pneg %p1333_p3  ;;  %s883_s29 = sshll.u32 %s1187_s27, 10 }
  0x2f   : > { %s291_s24 = scalar_lea.vmem [#allocation8], %s1273_s11  ;;  %s1350_s13 = scalar_lea.hbm %s1510_s5, %s883_s29 }
  0x30   : > { %s298_s30 = sshll.u32 %s291_s24, 4  ;;  %p1343_p6 = pnand %p956_p4, %p1517_p12  ;;  %s1352_s30 = int_to_ptr.vmem [resolvable:$true] %s298_s30 }
  0x31   : > { %s1061_s27 = scalar_lea.hbm %s1505_s0, 256 }
  0x32   : > { %p1062_p8 = scmp.ne.s32.totalorder %s1505_s0, %s1061_s27  ;;  %p1063_p10 = pneg %p1343_p6 }
  0x33   : > { %p1068_p13 = scmp.lt.u32.totalorder %s1061_s27, %s1505_s0 }
  0x34   : > { %p1064_p11 = pnand %p1063_p10, %p1062_p8 }
  0x36   : > { %p1065_p9 = pneg %p1064_p11 }
  0x38   : > { %p1070_p0 = pnand %p1068_p13, %p1065_p9 }
  0x3a   : > { %1073 = shalt.err (!%p1070_p0)
}
  0x3b   : > { %s1074_s29 = scalar_lea.vmem %s233_s17, 256  ;;  %p1082_p7 = scmp.lt.s32.totalorder %s233_s17, %s233_s17 }
  0x3c   : > { %p1075_p4 = scmp.ne.s32.totalorder %s233_s17, %s1074_s29  ;;  %p1083_p1 = scmp.lt.s32.totalorder %s1074_s29, %s1074_s29 }
  0x3e   : > { %p1077_p2 = pnand %p1075_p4, %p1063_p10  ;;  %p1084_p3 = por %p1083_p1, %p1082_p7 }
  0x40   : > { %p1078_p12 = pneg %p1077_p2 }
  0x42   : > { %p1085_p5 = pnand %p1084_p3, %p1078_p12 }
  0x44   : > { %1088 = shalt.err (!%p1085_p5)
}
  0x45   : > { %s1527_s10 = smov 4   ;;  %s1528_s12 = smov 64  }
  0x46   : > { %959 = dma.hbm_to_vmem [thread:$0]  (!%p1343_p6), %s1505_s0, 256, %s233_s17, [#allocation4], %s1528_s12, %s1528_s12, %s1527_s10  }
  0x47   : > { %s1089_s16 = scalar_lea.hbm %s1350_s13, 1024  ;;  %p1529_p8 = scmp.ne.s32.totalorder %s1523_s18, 0 }
  0x48   : > { %p1090_p2 = scmp.ne.s32.totalorder %s1350_s13, %s1089_s16  ;;  %s1094_s27 = scalar_lea.hbm %s1510_s5, 2048 }
  0x49   : > { %p1530_p7 = pneg %p1529_p8  ;;  %p1095_p1 = scmp.lt.u32.totalorder %s1350_s13, %s1510_s5 }
  0x4a   : > { %p1096_p3 = scmp.lt.u32.totalorder %s1094_s27, %s1089_s16  ;;  %p1098_p11 = scmp.lt.u32.totalorder %s1089_s16, %s1350_s13 }
  0x4b   : > { %p1092_p12 = pnand %p1090_p2, %p1530_p7 }
  0x4c   : > { %p1097_p10 = por %p1096_p3, %p1095_p1 }
  0x4d   : > { %p1093_p5 = pneg %p1092_p12 }
  0x4e   : > { %p1099_p9 = por %p1098_p11, %p1097_p10 }
  0x50   : > { %p1100_p13 = pnand %p1099_p9, %p1093_p5 }
  0x52   : > { %1103 = shalt.err (!%p1100_p13)
}
  0x53   : > { %s1104_s17 = scalar_lea.vmem %s1352_s30, 1024  ;;  %p1531_p0 = pmov %p1530_p7 }
  0x54   : > { %p1105_p6 = scmp.ne.s32.totalorder %s1352_s30, %s1104_s17  ;;  %s1194_s29 = smov [#allocation8]  }
  0x55   : > { %s1109_s14 = sshll.u32 %s1194_s29, 4  ;;  %s1110_s14 = int_to_ptr.vmem [resolvable:$false] %s1109_s14 }
  0x56   : > { %p1107_p4 = pnand %p1105_p6, %p1531_p0  ;;  %s1111_s15 = scalar_lea.vmem %s1110_s14, 2048 }
  0x57   : > { %p1112_p7 = scmp.lt.s32.totalorder %s1352_s30, %s1110_s14  ;;  %p1113_p12 = scmp.lt.s32.totalorder %s1111_s15, %s1104_s17 }
  0x58   : > { %p1108_p2 = pneg %p1107_p4 }
  0x59   : > { %p1114_p1 = por %p1113_p12, %p1112_p7 }
  0x5b   : > { %p1115_p3 = pnand %p1114_p1, %p1108_p2 }
  0x5d   : > { %1118 = shalt.err (!%p1115_p3)
}
  0x5e   : > { %966 = dma.hbm_to_vmem [thread:$0]  (!%p1529_p8), %s1350_s13, 1024, %s1352_s30, %s1288_s19, %s1528_s12, %s1528_s12, %s1527_s10  }
  0x5f   : > { %p1532_p5 = scmp.ne.s32.totalorder %s1525_s23, 0 }
  0x60   : > { %p1533_p10 = scmp.eq.s32.totalorder (!%p1532_p5), %s1319_s21, 0 }
  0x61   : > { %310 = sbr.rel (%p1532_p5) target bundleno = 692 (0x2b4), region = 48 }
  0x68   : > { %1162 = dma.done.wait (%p1533_p10), [#allocation4], 256   ;;  %p1534_p11 = pmov %p1533_p10 }
  0x69   : > { %s316_s18 = sand.u32 1, %s1319_s21   ;;  %s318_s16 = sand.u32 1, %s1179_s25  }
  0x6a   : > { %1164 = vsyncadd (%p1534_p11), [#allocation4], 4294967040  ;;  %s854_s20 = sshll.u32 %s318_s16, 6  ;;  %s317_s9 = scalar_lea.sflag [#allocation7], %s316_s18 }
  0x6b   : > { %s1408_s27 = scalar_lea.vmem [#allocation6], %s854_s20  ;;  %p1535_p9 = scmp.ne.s32.totalorder %s1524_s22, 0 }
  0x6d   : > { %1166 = dma.done.wait (%p1535_p9), %s317_s9, 2048  }
  0x6e   : > { %1168 = vsyncadd (%p1535_p9), %s317_s9, 4294965248  ;;  %p369_p8 = scmp.lt.s32.totalorder %s1319_s21, 1  ;;  %s1430_s29 = scalar_lea.vmem [#allocation8], %s854_s20 }
  0x6f   : > { %p1536_p13 = scmp.ne.s32.totalorder %s1319_s21, 0 }
  0x70   : > { %s1416_s19 = scalar_select %p369_p8, %s1319_s21, 1 }
  0x71   : > { %383 = sbr.rel (%p1536_p13) target bundleno = 120 (0x78), region = 64  ;;  %v857_v0 = vld [vmem:[%s1511_s6] ss:$0 sm:$0xff] (!%p1536_p13) }
  0x72   : > { %s371_s13 = scalar_lea.vmem %s1507_s2, %s1416_s19  ;;  %s374_s11 = scalar_lea.vmem %s1508_s3, %s1416_s19  ;;  %391 = vst [vmem:[#allocation2] sm:$0xff] (!%p1536_p13), %v857_v0  ;;  %392 = vst [vmem:[#allocation2 + $0x8] sm:$0xff] (!%p1536_p13), %v857_v0 }
  0x73   : > { %s377_s22 = scalar_lea.vmem %s1509_s4, %s1416_s19  ;;  %393 = vst [vmem:[#allocation2 + $0x10] sm:$0xff] (!%p1536_p13), %v857_v0  ;;  %394 = vst [vmem:[#allocation2 + $0x18] sm:$0xff] (!%p1536_p13), %v857_v0 }
  0x78 PF: > { %v1011_v1 = vld [vmem:[%s1408_s27] sm:$0xff]   ;;  %v1012_v2 = vld [vmem:[%s1408_s27 + $0x8] sm:$0xff]   ;;  %v1013_v3 = vld [vmem:[%s1408_s27 + $0x10] sm:$0xff]   ;;  %v563_v57 = vlaneseq  ;;  %p878_p6 = scmp.ne.s32.totalorder %s1319_s21, 1 }
  0x79   : > { %904 = vmatprep.subr.bf16.mxu0 %v1011_v1  ;;  %v1014_v4 = vld [vmem:[%s1408_s27 + $0x18] sm:$0xff]   ;;  %v1019_v5 = vld [vmem:[#allocation3] sm:$0xff]   ;;  %v1015_v6 = vld [vmem:[%s1408_s27 + $0x20] sm:$0xff]  }
  0x7a   : > { %905 = vmatpush3.bf16.msra.mxu0 %v1011_v1  ;;  %920 = vmatprep.mubr.bf16.mxu0 %v1019_v5  ;;  %v1016_v7 = vld [vmem:[%s1408_s27 + $0x28] sm:$0xff]   ;;  %v1017_v8 = vld [vmem:[%s1408_s27 + $0x30] sm:$0xff]   ;;  %v1018_v9 = vld [vmem:[%s1408_s27 + $0x38] sm:$0xff]   ;;  %v564_v58 = vshrl.u32 %v563_v57, 7 }
  0x7b   : > { %906 = vmatprep.subr.bf16.mxu0 %v1012_v2  ;;  %v1020_v10 = vld [vmem:[#allocation3 + $0x8] sm:$0xff]   ;;  %v1021_v11 = vld [vmem:[%s1430_s29] sm:$0xff]   ;;  %v1022_v12 = vld [vmem:[%s1430_s29 + $0x8] sm:$0xff]  }
  0x7c   : > { %924 = vmatprep.subr.bf16.mxu1 %v1021_v11  ;;  %v1023_v13 = vld [vmem:[%s1430_s29 + $0x10] sm:$0xff]   ;;  %v1024_v14 = vld [vmem:[%s1430_s29 + $0x18] sm:$0xff]   ;;  %v1025_v15 = vld [vmem:[%s1430_s29 + $0x20] sm:$0xff]   ;;  %v565_v60 = vsub.s32 0, %v564_v58 }
  0x7d   : > { %925 = vmatpush3.bf16.msra.mxu1 %v1021_v11  ;;  %v1026_v16 = vld [vmem:[%s1430_s29 + $0x28] sm:$0xff]   ;;  %v1027_v17 = vld [vmem:[%s1430_s29 + $0x30] sm:$0xff]   ;;  %v1028_v18 = vld [vmem:[%s1430_s29 + $0x38] sm:$0xff]  }
  0x7e   : > { %907 = vmatpush3.bf16.msra.mxu0 %v1012_v2  ;;  %926 = vmatprep.subr.bf16.mxu1 %v1022_v12  ;;  %v858_v20 = vld [vmem:[%s371_s13] ss:$0 sm:$0xff] }
  0x7f   : > { %908 = vmatprep.subr.bf16.mxu0 %v1013_v3  ;;  %v561_v59 = vld [vmem:[%s374_s11] sm:$0x1] }
  0x80   : > { %v869_v0 = vld [vmem:[%s377_s22] ss:$0 sm:$0xff] }
  0x81   : > { %927 = vmatpush3.bf16.msra.mxu1 %v1022_v12 }
  0x82   : > { %909 = vmatpush3.bf16.msra.mxu0 %v1013_v3  ;;  %928 = vmatprep.subr.bf16.mxu1 %v1023_v13 }
  0x83   : > { %910 = vmatprep.subr.bf16.mxu0 %v1014_v4 }
  0x85   : > { %929 = vmatpush3.bf16.msra.mxu1 %v1023_v13 }
  0x86   : > { %911 = vmatpush3.bf16.msra.mxu0 %v1014_v4  ;;  %930 = vmatprep.subr.bf16.mxu1 %v1024_v14 }
  0x87   : > { %912 = vmatprep.subr.bf16.mxu0 %v1015_v6 }
  0x89   : > { %931 = vmatpush3.bf16.msra.mxu1 %v1024_v14 }
  0x8a   : > { %913 = vmatpush3.bf16.msra.mxu0 %v1015_v6  ;;  %932 = vmatprep.subr.bf16.mxu1 %v1025_v15 }
  0x8b   : > { %914 = vmatprep.subr.bf16.mxu0 %v1016_v7 }
  0x8d   : > { %933 = vmatpush3.bf16.msra.mxu1 %v1025_v15  ;;  %v588_v15 = vld [vmem:[#allocation2 + $0x10] sm:$0xff] }
  0x8e   : > { %915 = vmatpush3.bf16.msra.mxu0 %v1016_v7  ;;  %934 = vmatprep.subr.bf16.mxu1 %v1026_v16 }
  0x8f   : > { %916 = vmatprep.subr.bf16.mxu0 %v1017_v8 }
  0x91   : > { %935 = vmatpush3.bf16.msra.mxu1 %v1026_v16  ;;  %v586_v16 = vld [vmem:[#allocation2] sm:$0xff] }
  0x92   : > { %917 = vmatpush3.bf16.msra.mxu0 %v1017_v8  ;;  %936 = vmatprep.subr.bf16.mxu1 %v1027_v17 }
  0x93   : > { %918 = vmatprep.subr.bf16.mxu0 %v1018_v9 }
  0x95   : > { %937 = vmatpush3.bf16.msra.mxu1 %v1027_v17 }
  0x96   : > { %919 = vmatpush3.bf16.msra.mxu0 %v1018_v9  ;;  %938 = vmatprep.subr.bf16.mxu1 %v1028_v18 }
  0x99   : > { %921 = vmatmul.mubr.bf16.vlgmr.msra.gmra.mrb[0].mxu0 %v1020_v10  ;;  %939 = vmatpush3.bf16.msra.mxu1 %v1028_v18  ;;  %v589_v18 = vld [vmem:[#allocation2 + $0x18] sm:$0xff] }
 0x16c   : > { %v922_v19 = vpop.f32.mrb[0].mxu0 }
 0x16d   : > { %v516_v21 = vpop.f32.mrb[1].mxu0  ;;  %v525_v26 = vadd.f32 %v922_v19, %v858_v20 }
 0x16e   : > { %v923_v22 = vpop.f32.mrb[2].mxu0  ;;  %v517_v24 = vadd.f32 %v858_v20, %v516_v21  ;;  %v587_v21 = vld [vmem:[#allocation2 + $0x8] sm:$0xff] }
 0x16f   : > { %v519_v23 = vpop.f32.mrb[3].mxu0  ;;  %v528_v28 = vadd.f32 %v923_v22, %v858_v20 }
 0x170   : > { %v520_v25 = vadd.f32 %v858_v20, %v519_v23 }
 0x172   : > { %v531_v27 = vadd.f32 %v520_v25, %v517_v24 }
 0x174   : > { %v532_v29 = vadd.f32 %v531_v27, %v525_v26 }
 0x176   : > { %v533_v30 = vadd.f32 %v532_v29, %v528_v28 }
 0x178   : > { %v534_v31 = vrot.slane %v533_v30, 4 }
 0x17a   : > { %v535_v32 = vadd.f32 %v534_v31, %v533_v30 }
 0x17c   : > { %v536_v33 = vrot.slane %v535_v32, 2 }
 0x17e   : > { %v537_v34 = vadd.f32 %v536_v33, %v535_v32 }
 0x180   : > { %v538_v35 = vrot.slane %v537_v34, 1 }
 0x182   : > { %v539_v36 = vadd.f32 %v538_v35, %v537_v34 }
 0x184   : > { %v540_v37 = vmul.f32 0.03125, %v539_v36 }
 0x186   : > { %v541_v38 = vsub.f32 %v517_v24, %v540_v37  ;;  %v542_v39 = vsub.f32 %v520_v25, %v540_v37  ;;  %v543_v40 = vsub.f32 %v525_v26, %v540_v37  ;;  %v544_v41 = vsub.f32 %v528_v28, %v540_v37 }
 0x188   : > { %v545_v42 = vmul.f32 %v541_v38, %v541_v38  ;;  %v546_v43 = vmul.f32 %v542_v39, %v542_v39  ;;  %v547_v44 = vmul.f32 %v543_v40, %v543_v40  ;;  %v548_v46 = vmul.f32 %v544_v41, %v544_v41 }
 0x18a   : > { %v549_v45 = vadd.f32 %v546_v43, %v545_v42 }
 0x18c   : > { %v550_v47 = vadd.f32 %v549_v45, %v547_v44 }
 0x18e   : > { %v551_v48 = vadd.f32 %v550_v47, %v548_v46 }
 0x190   : > { %v552_v49 = vrot.slane %v551_v48, 4 }
 0x192   : > { %v553_v50 = vadd.f32 %v552_v49, %v551_v48 }
 0x194   : > { %v554_v51 = vrot.slane %v553_v50, 2 }
 0x196   : > { %v555_v52 = vadd.f32 %v554_v51, %v553_v50 }
 0x198   : > { %v556_v53 = vrot.slane %v555_v52, 1 }
 0x19a   : > { %v557_v54 = vadd.f32 %v556_v53, %v555_v52 }
 0x19c   : > { %v558_v55 = vmul.f32 0.03125, %v557_v54 }
 0x19e   : > { %v559_v56 = vadd.f32 1e-05, %v558_v55 }
 0x1a0   : > { %1029 = vrsqrt.f32 %v559_v56 }
 0x1aa   : > { %v1030_v61 = vpop.eup %1029 }
 0x1ab   : > { %v562_v62 = vmul.f32 %v1030_v61, %v561_v59 }
 0x1ad   : > { %v566_v63 = vrot.slane %v562_v62, %v565_v60 }
 0x1af   : > { %v567_v1 = vmul.f32 %v566_v63, %v541_v38  ;;  %v568_v2 = vmul.f32 %v566_v63, %v542_v39  ;;  %v569_v3 = vmul.f32 %v566_v63, %v543_v40  ;;  %v570_v4 = vmul.f32 %v566_v63, %v544_v41 }
 0x1b1   : > { %v578_v5 = vadd.f32 %v869_v0, %v567_v1  ;;  %v579_v6 = vadd.f32 %v869_v0, %v568_v2  ;;  %v580_v7 = vadd.f32 %v869_v0, %v569_v3  ;;  %v581_v8 = vadd.f32 %v869_v0, %v570_v4 }
 0x1b3   : > { %v582_v9 = vmax.f32 %v578_v5, 0.0  ;;  %v583_v10 = vmax.f32 %v579_v6, 0.0  ;;  %v584_v11 = vmax.f32 %v580_v7, 0.0  ;;  %v585_v12 = vmax.f32 %v581_v8, 0.0 }
 0x1b5   : > { %v590_v13 = vpack.c.bf16 %v583_v10, %v582_v9  ;;  %v591_v14 = vpack.c.bf16 %v585_v12, %v584_v11 }
 0x1b7   : > { %940 = vmatprep.mubr.bf16.mxu1 %v590_v13 }
 0x1b8   : > { %941 = vmatmul.mubr.bf16.vlgmr.msra.gmra.mrb[0].mxu1 %v591_v14 }
 0x28b   : > { %v942_v17 = vpop.f32.mrb[0].mxu1  ;;  %716 = sbr.rel (%p878_p6) target bundleno = 666 (0x29a), region = 68 }
 0x28c   : > { %v707_v19 = vadd.f32 %v942_v17, %v588_v15  ;;  %v690_v20 = vpop.f32.mrb[1].mxu1 }
 0x28d   : > { %v705_v22 = vadd.f32 %v690_v20, %v586_v16  ;;  %v943_v23 = vpop.f32.mrb[2].mxu1 }
 0x28e   : > { %711 = vst [vmem:[#allocation2 + $0x10] sm:$0xff] %v707_v19  ;;  %v708_v24 = vadd.f32 %v943_v23, %v589_v18  ;;  %v693_v25 = vpop.f32.mrb[3].mxu1 }
 0x28f   : > { %709 = vst [vmem:[#allocation2] sm:$0xff] %v705_v22  ;;  %v706_v26 = vadd.f32 %v693_v25, %v587_v21 }
 0x290   : > { %712 = vst [vmem:[#allocation2 + $0x18] sm:$0xff] %v708_v24 }
 0x291   : > { %710 = vst [vmem:[#allocation2 + $0x8] sm:$0xff] %v706_v26 }
 0x295   : > { %v719_v29 = vld [vmem:[#allocation2 + $0x10] sm:$0xff] }
 0x296   : > { %v717_v27 = vld [vmem:[#allocation2] sm:$0xff]  ;;  %723 = vst [vmem:[#allocation9 + $0x10] sm:$0xff] %v719_v29 }
 0x297   : > { %721 = vst [vmem:[#allocation9] sm:$0xff] %v717_v27  ;;  %v720_v30 = vld [vmem:[#allocation2 + $0x18] sm:$0xff] }
 0x298   : > { %v718_v28 = vld [vmem:[#allocation2 + $0x8] sm:$0xff]  ;;  %724 = vst [vmem:[#allocation9 + $0x18] sm:$0xff] %v720_v30 }
 0x299   : > { %722 = vst [vmem:[#allocation9 + $0x8] sm:$0xff] %v718_v28 }
 0x29a PF: > { %p970_p0 = scmp.eq.s32.totalorder %s1319_s21, 1  ;;  %s1195_s19 = smov [#allocation9]  }
 0x29b   : > { %s731_s30 = sshll.u32 %s1195_s19, 4  ;;  %s732_s30 = int_to_ptr.vmem [resolvable:$true] %s731_s30 }
 0x29c   : > { %s1119_s13 = scalar_lea.vmem %s732_s30, 512  ;;  %p1126_p12 = scmp.lt.s32.totalorder %s732_s30, %s732_s30 }
 0x29d   : > { %p1120_p4 = scmp.ne.s32.totalorder %s732_s30, %s1119_s13  ;;  %p1127_p1 = scmp.lt.s32.totalorder %s1119_s13, %s1119_s13 }
 0x29f   : > { %p1121_p2 = pnand %p1120_p4, %p970_p0  ;;  %p1128_p3 = por %p1127_p1, %p1126_p12 }
 0x2a1   : > { %p1122_p7 = pneg %p1121_p2 }
 0x2a3   : > { %p1129_p5 = pnand %p1128_p3, %p1122_p7 }
 0x2a5   : > { %1132 = shalt.err (!%p1129_p5)
}
 0x2a6   : > { %s1133_s11 = scalar_lea.hbm %s1512_s7, 512 }
 0x2a7   : > { %p1134_p10 = scmp.ne.s32.totalorder %s1512_s7, %s1133_s11  ;;  %p1139_p8 = scmp.lt.u32.totalorder %s1133_s11, %s1512_s7 }
 0x2a9   : > { %p1135_p11 = pnand %p1134_p10, %p970_p0 }
 0x2ab   : > { %p1136_p9 = pneg %p1135_p11 }
 0x2ad   : > { %p1141_p13 = pnand %p1139_p8, %p1136_p9 }
 0x2af   : > { %1144 = shalt.err (!%p1141_p13)
}
 0x2b0   : > { %s1196_s14 = smov 128   ;;  %s1197_s15 = smov 8  }
 0x2b1   : > { %953 = dma.vmem_to_hbm [thread:$0]  (%p970_p0), %s732_s30, 512, %s1512_s7, [#allocation5], %s1196_s14, %s1196_s14, %s1197_s15  }
 0x2b2   : > { %1170 = dma.done.wait (%p970_p0), [#allocation5], 512  }
 0x2b3   : > { %1172 = vsyncadd (%p970_p0), [#allocation5], 4294966784 }
 0x2b4 PF: > { %p19_p6 = scmp.ge.s32.totalorder %s1259_s28, 4   ;;  %s1537_s24 = smov %s1179_s25 }
 0x2b5   : > { %s1538_s25 = smov %s1183_s26  ;;  %s1539_s26 = smov %s1268_s8 }
 0x2b6   : > { %s1540_s27 = smov %s1259_s28  ;;  %21 = sbr.rel (!%p19_p6) target bundleno = 5 (0x5), region = 118 }
 0x2bd   :  { %747 = vsyncpa [#allocation4], 1 }
 0x2be   :  { %749 = vsyncpa [#allocation4 + $0x1], 1 }
 0x2bf   :  { %750 = vsyncpa [#allocation7], 1 }
 0x2c0   :  { %752 = vsyncpa [#allocation7 + $0x1], 1 }
 0x2c1   :  { %753 = vsyncpa [#allocation5], 1 }
 0x2c2   :  { %755 = vsyncpa [#allocation5 + $0x1], 1 }

</bundles_post_ra>
